<compile_context>
chip_gen: v5e
topology: v5e:2x2
jax: 0.10.0
libtpu: 0.0.40
codegen_flags: <defaults>
</compile_context>

<pallas_src>
import math

import jax
import jax.numpy as jnp
from jax.experimental import pallas as pl
from jax.experimental.pallas import tpu as pltpu


def _gcn_kernel(adj_ref, w_ref, b_ref, x_ref, o_ref):
    bN, V, C_in = x_ref.shape
    C_out = w_ref.shape[1]

    # (1) Channel contraction first as one big (bN*V, C_in) @ (C_in, C_out)
    #     MXU dot with f32 accumulation.  Collapsing the leading dims of x is
    #     a free reshape (lane dim unchanged).  Associativity makes this exact
    #     w.r.t. the PyTorch order and shrinks the intermediate when
    #     C_out <= C_in.
    xw = jnp.dot(x_ref[...].reshape(bN * V, C_in), w_ref[...],
                 preferred_element_type=jnp.float32)            # (bN*V, C_out)

    # (2) Repack (bN, V, C_out) -> (V, bN*C_out) so the adjacency contraction
    #     is ONE lane-dense MXU dot instead of bN tiny ones.  The relayout is
    #     XLU work on a small tile; the MXU/VST slots stay the bottleneck.
    y = xw.reshape(bN, V, C_out).transpose(1, 0, 2).reshape(V, bN * C_out)
    y = y.astype(adj_ref.dtype)     # no-op for f32; bf16 path feeds bf16 MXU

    out = jnp.dot(adj_ref[...], y,
                  preferred_element_type=jnp.float32)           # (V, bN*C_out)
    out = out + b_ref[...]                                      # (1, bN*C_out)

    # Lane-dense store: last dim is bN*C_out (a large multiple of C_out).
    o_ref[0] = out.astype(o_ref.dtype)


def graph_convolution_cat(x, adj, weight, bias=None, *, block_n=None,
                          compute_dtype=None):
    """GraphConvolution_cat forward.

    x: (N, V, C_in), adj: (V, V), weight: (C_in, C_out), bias: (C_out,)|None.
    Returns (N, V, C_out) in x.dtype.
    """
    N, V, C_in = x.shape
    C_out = weight.shape[1]
    out_dtype = x.dtype

    # Optional bf16 MXU inputs (f32 accumulation is kept inside the kernel).
    if compute_dtype is not None:
        x = x.astype(compute_dtype)
        adj = adj.astype(compute_dtype)
        weight = weight.astype(compute_dtype)

    # Batch block: pack enough batch elements per grid step that the packed
    # output slab (V, bN*C_out) is lane-dense (target >= ~512 lanes, the
    # measured lever for unmasked vst), capped at the full batch.
    if block_n is None:
        block_n = max(1, min(N, pl.cdiv(512, C_out)))
    bN = int(block_n)
    G = pl.cdiv(N, bN)
    N_pad = G * bN
    if N_pad != N:
        x = jnp.pad(x, ((0, N_pad - N), (0, 0), (0, 0)))

    if bias is None:
        bias_packed = jnp.zeros((1, bN * C_out), dtype=jnp.float32)
    else:
        # Column n*C_out + c of the packed slab gets bias[c].
        bias_packed = jnp.tile(bias.astype(jnp.float32).reshape(1, C_out),
                               (1, bN))                       # (1, bN*C_out)

    out_packed = pl.pallas_call(
        _gcn_kernel,
        out_shape=jax.ShapeDtypeStruct((G, V, bN * C_out), out_dtype),
        grid_spec=pltpu.PrefetchScalarGridSpec(
            num_scalar_prefetch=0,
            grid=(G,),
            in_specs=[
                # Grid-invariant operands: constant index_map -> DMA'd once,
                # VMEM-resident across every batch block.
                pl.BlockSpec((V, V), lambda i: (0, 0)),            # adj
                pl.BlockSpec((C_in, C_out), lambda i: (0, 0)),     # weight
                pl.BlockSpec((1, bN * C_out), lambda i: (0, 0)),   # bias
                # Streamed batch block of x (double-buffered by Pallas).
                pl.BlockSpec((bN, V, C_in), lambda i: (i, 0, 0)),
            ],
            out_specs=pl.BlockSpec((1, V, bN * C_out), lambda i: (i, 0, 0)),
        ),
        compiler_params=pltpu.CompilerParams(
            dimension_semantics=("parallel",)),
    )(adj, weight, bias_packed, x)

    # Un-pack (G, V, bN*C_out) -> (N, V, C_out): wrapper-side layout plumbing.
    out = (out_packed.reshape(G, V, bN, C_out)
           .transpose(0, 2, 1, 3)
           .reshape(N_pad, V, C_out))
    return out[:N]


def _kaiming_uniform(key, in_features, out_features):
    # torch.nn.init.kaiming_uniform_ (a=0, fan_in = tensor.size(1) =
    # out_features, gain = sqrt(2)) as called by this module's
    # reset_parameters.
    fan_in = out_features
    bound = math.sqrt(2.0) * math.sqrt(3.0 / fan_in)
    return jax.random.uniform(key, (in_features, out_features),
                              dtype=jnp.float32, minval=-bound, maxval=bound)


if __name__ == "__main__":
    key = jax.random.PRNGKey(0)
    k_x, k_adj, k_w, k_x2, k_adj2, k_w2 = jax.random.split(key, 6)

    # Config 1: shapes consistent with a skeleton-GCN style module.
    N, V, C_in, C_out = 2, 16, 32, 32
    x = jax.random.normal(k_x, (N, V, C_in), dtype=jnp.float32)
    adj = jax.random.uniform(k_adj, (V, V), dtype=jnp.float32)
    weight = _kaiming_uniform(k_w, C_in, C_out)
    bias = jnp.zeros((C_out,), dtype=jnp.float32)          # init.zeros_

    out = jax.block_until_ready(graph_convolution_cat(x, adj, weight, bias))
    ref = jnp.einsum('nik,kj->nij',
                     jnp.einsum('vw,nwc->nvc', adj, x), weight) + bias
    assert out.shape == (N, V, C_out)
    assert jnp.allclose(out, ref, atol=1e-4, rtol=1e-4)

    # Config 2: non-divisible batch (padding path), multi-step grid,
    # asymmetric channels, nonzero bias.
    N2, V2, Ci2, Co2 = 3, 16, 32, 16
    x2 = jax.random.normal(k_x2, (N2, V2, Ci2), dtype=jnp.float32)
    adj2 = jax.random.uniform(k_adj2, (V2, V2), dtype=jnp.float32)
    w2 = _kaiming_uniform(k_w2, Ci2, Co2)
    b2 = jax.random.normal(jax.random.PRNGKey(1), (Co2,), dtype=jnp.float32)

    out2 = jax.block_until_ready(
        graph_convolution_cat(x2, adj2, w2, b2, block_n=2))
    ref2 = jnp.einsum('nik,kj->nij',
                      jnp.einsum('vw,nwc->nvc', adj2, x2), w2) + b2
    assert out2.shape == (N2, V2, Co2)
    assert jnp.allclose(out2, ref2, atol=1e-4, rtol=1e-4)

    # Config 3: no-bias path (bias=None in the PyTorch module).
    out3 = jax.block_until_ready(graph_convolution_cat(x, adj, weight, None))
    ref3 = jnp.einsum('nik,kj->nij',
                      jnp.einsum('vw,nwc->nvc', adj, x), weight)
    assert jnp.allclose(out3, ref3, atol=1e-4, rtol=1e-4)

    print("KERNEL_OK")
</pallas_src>

<mosaic_0001>
module attributes {stable_mosaic.version = 11 : i64} {
  func.func @_gcn_kernel(%arg0: i32, %arg1: memref<16x16xf32, #tpu.memory_space<vmem>>, %arg2: memref<32x32xf32, #tpu.memory_space<vmem>>, %arg3: memref<1x64xf32, #tpu.memory_space<vmem>>, %arg4: memref<2x16x32xf32, #tpu.memory_space<vmem>>, %arg5: memref<1x16x64xf32, #tpu.memory_space<vmem>>) attributes {dimension_semantics = [#tpu.dimension_semantics<parallel>], iteration_bounds = array<i64: 1>, scalar_prefetch = 0 : i64, scratch_operands = 0 : i64, tpu.core_type = #tpu.core_type<tc>, window_params = [{pipeline_mode = #tpu.pipeline_mode<synchronous>, transform_indices = @transform_0, window_bounds = array<i64: 16, 16>}, {pipeline_mode = #tpu.pipeline_mode<synchronous>, transform_indices = @transform_1, window_bounds = array<i64: 32, 32>}, {pipeline_mode = #tpu.pipeline_mode<synchronous>, transform_indices = @transform_2, window_bounds = array<i64: 1, 64>}, {transform_indices = @transform_3, window_bounds = array<i64: 2, 16, 32>}, {transform_indices = @transform_4, window_bounds = array<i64: 1, 16, 64>}]} {
    %c0 = arith.constant 0 : index
    %c0_0 = arith.constant 0 : index
    %c0_1 = arith.constant 0 : index
    %0 = vector.load %arg4[%c0, %c0_0, %c0_1] : memref<2x16x32xf32, #tpu.memory_space<vmem>>, vector<2x16x32xf32>
    %1 = vector.shape_cast %0 : vector<2x16x32xf32> to vector<32x32xf32>
    %c0_2 = arith.constant 0 : index
    %c0_3 = arith.constant 0 : index
    %2 = vector.load %arg2[%c0_2, %c0_3] : memref<32x32xf32, #tpu.memory_space<vmem>>, vector<32x32xf32>
    %cst = arith.constant dense<0.000000e+00> : vector<32x32xf32>
    %3 = tpu.matmul %1, %2, %cst {dimension_numbers = #tpu.dot_dimension_numbers<[1], [0], [0], [1], [0, 0, 1, 1], [], []>} : vector<32x32xf32>, vector<32x32xf32>, vector<32x32xf32> -> vector<32x32xf32>
    %4 = vector.shape_cast %3 : vector<32x32xf32> to vector<2x16x32xf32>
    %5 = tpu.transpose %4, [1, 0, 2] : vector<2x16x32xf32> -> vector<16x2x32xf32>
    %6 = vector.shape_cast %5 : vector<16x2x32xf32> to vector<16x64xf32>
    %c0_4 = arith.constant 0 : index
    %c0_5 = arith.constant 0 : index
    %7 = vector.load %arg1[%c0_4, %c0_5] : memref<16x16xf32, #tpu.memory_space<vmem>>, vector<16x16xf32>
    %cst_6 = arith.constant dense<0.000000e+00> : vector<16x64xf32>
    %8 = tpu.matmul %7, %6, %cst_6 {dimension_numbers = #tpu.dot_dimension_numbers<[1], [0], [0], [1], [0, 0, 1, 1], [], []>} : vector<16x16xf32>, vector<16x64xf32>, vector<16x64xf32> -> vector<16x64xf32>
    %c0_7 = arith.constant 0 : index
    %c0_8 = arith.constant 0 : index
    %9 = vector.load %arg3[%c0_7, %c0_8] : memref<1x64xf32, #tpu.memory_space<vmem>>, vector<1x64xf32>
    %10 = vector.broadcast %9 : vector<1x64xf32> to vector<16x64xf32>
    %11 = arith.addf %8, %10 : vector<16x64xf32>
    %c0_9 = arith.constant 0 : index
    %c0_10 = arith.constant 0 : index
    %c0_11 = arith.constant 0 : index
    %12 = vector.load %arg5[%c0_9, %c0_10, %c0_11] : memref<1x16x64xf32, #tpu.memory_space<vmem>>, vector<1x16x64xf32>
    %13 = vector.shape_cast %12 : vector<1x16x64xf32> to vector<16x64xf32>
    %14 = vector.shape_cast %11 : vector<16x64xf32> to vector<1x16x64xf32>
    tpu.vector_store %arg5[%c0_9, %c0_10, %c0_11], %14 {strides = array<i32>} : memref<1x16x64xf32, #tpu.memory_space<vmem>>, vector<1x16x64xf32>,
    return
  }
  func.func @transform_0(%arg0: i32) -> (i32, i32) {
    %c0_i32 = arith.constant 0 : i32
    %c0_i32_0 = arith.constant 0 : i32
    %c0_i32_1 = arith.constant 0 : i32
    return %c0_i32, %c0_i32_0 : i32, i32
  }
  func.func @transform_1(%arg0: i32) -> (i32, i32) {
    %c0_i32 = arith.constant 0 : i32
    %c0_i32_0 = arith.constant 0 : i32
    %c0_i32_1 = arith.constant 0 : i32
    return %c0_i32, %c0_i32_0 : i32, i32
  }
  func.func @transform_2(%arg0: i32) -> (i32, i32) {
    %c0_i32 = arith.constant 0 : i32
    %c0_i32_0 = arith.constant 0 : i32
    %c0_i32_1 = arith.constant 0 : i32
    return %c0_i32, %c0_i32_0 : i32, i32
  }
  func.func @transform_3(%arg0: i32) -> (i32, i32, i32) {
    %c0_i32 = arith.constant 0 : i32
    %c0_i32_0 = arith.constant 0 : i32
    %c0_i32_1 = arith.constant 0 : i32
    return %arg0, %c0_i32, %c0_i32_0 : i32, i32, i32
  }
  func.func @transform_4(%arg0: i32) -> (i32, i32, i32) {
    %c0_i32 = arith.constant 0 : i32
    %c0_i32_0 = arith.constant 0 : i32
    %c0_i32_1 = arith.constant 0 : i32
    return %arg0, %c0_i32, %c0_i32_0 : i32, i32, i32
  }
}

</mosaic_0001>

<bundles_post_ra>
// kernel: tpu_custom_call.1
= control target key start
LH: loop header
LB: loop body
LE: loop exit
PB: predicated region body
PF: predicated region fallthrough
CT: control target
= control target key end

     0   :  { %9 = vsyncpa [#allocation3], 0  ;;  %s631_s0 = inlined_call_operand.hbm [shape: f32[16,16], index: 0, kind: input, shape index: {}]   ;;  %s632_s1 = inlined_call_operand.hbm [shape: f32[32,32], index: 1, kind: input, shape index: {}]   ;;  %s633_s2 = inlined_call_operand.vmem [shape: f32[1,64], index: 2, kind: input, shape index: {}]   ;;  %s634_s3 = inlined_call_operand.hbm [shape: f32[2,16,32], index: 3, kind: input, shape index: {}]   ;;  %s635_s4 = inlined_call_operand.hbm [shape: f32[1,16,64], index: 4, kind: output, shape index: {}]  }
   0x1   :  { %10 = vsyncpa [#allocation6], 0 }
   0x2   :  { %11 = vsyncpa [#allocation4], 0  ;;  %s29_s17 = sshll.u32 %s632_s1, 4  ;;  %s496_s18 = smov [#allocation5]   ;;  %s30_s17 = int_to_ptr.hbm [resolvable:$true] %s29_s17 }
   0x3   :  { %s31_s19 = sshll.u32 %s496_s18, 4  ;;  %s16_s22 = sshll.u32 %s631_s0, 4  ;;  %s32_s19 = int_to_ptr.vmem [resolvable:$true] %s31_s19  ;;  %s17_s22 = int_to_ptr.hbm [resolvable:$true] %s16_s22 }
   0x4   :  { %s497_s23 = smov 128   ;;  %s498_s24 = smov 8  }
   0x5   :  { %37 = dma.hbm_to_vmem [thread:$0]  %s30_s17, 512, %s32_s19, [#allocation6], %s497_s23, %s497_s23, %s498_s24  }
   0x6   :  { %s499_s25 = smov [#allocation2]   ;;  %s44_s1 = sshll.u32 %s634_s3, 4  ;;  %s45_s1 = int_to_ptr.hbm [resolvable:$true] %s44_s1 }
   0x7   :  { %s18_s26 = sshll.u32 %s499_s25, 4  ;;  %s500_s0 = smov [#allocation7]   ;;  %s19_s26 = int_to_ptr.vmem [resolvable:$true] %s18_s26 }
   0x8   :  { %24 = dma.hbm_to_vmem [thread:$0]  %s17_s22, 256, %s19_s26, [#allocation3], %s497_s23, %s497_s23, %s498_s24  }
   0x9   :  { %s46_s29 = sshll.u32 %s500_s0, 4  ;;  %s47_s29 = int_to_ptr.vmem [resolvable:$true] %s46_s29 }
   0xa   :  { %52 = dma.hbm_to_vmem [thread:$0]  %s45_s1, 512, %s47_s29, [#allocation6], %s497_s23, %s497_s23, %s498_s24  }
   0xb   :  { %490 = dma.done.wait [#allocation3], 256  }
   0xc   :  { %491 = vsyncadd [#allocation3], 4294967040 }
   0xd   :  { %492 = dma.done.wait [#allocation6], 1024  }
   0xe   :  { %493 = vsyncadd [#allocation6], 4294966272  ;;  %v72_v0 = vld [vmem:[#allocation5 + $0x18] sm:$0xff]  ;;  %v71_v1 = vld [vmem:[#allocation5 + $0x10] sm:$0xff]  ;;  %vm73_vm0 = vcmask 261120   ;;  %vm116_vm1 = vcmask 1047556  }
   0xf   :  { %371 = vmatpush.msra.mxu2 %v72_v0  ;;  %372 = vmatpush.msra.mxu3 %v72_v0  ;;  %v70_v2 = vld [vmem:[#allocation5 + $0x8] sm:$0xff]  ;;  %v69_v3 = vld [vmem:[#allocation5] sm:$0xff]  ;;  %v68_v5 = vld [vmem:[#allocation7 + $0x18] sm:$0xff]  ;;  %v501_v8 = vmov 1983009808   ;;  %s503_s3 = smov 32  }
  0x10   :  { %98 = vmatpush.msra.mxu0 %v72_v0  ;;  %v66_v4 = vld [vmem:[#allocation7 + $0x8] sm:$0xff]  ;;  %v65_v6 = vld [vmem:[#allocation7] sm:$0xff]  ;;  %v67_v7 = vld [vmem:[#allocation7 + $0x10] sm:$0xff]  ;;  %v119_v9 = vunpack.c.l.s4 %v501_v8  ;;  %v502_v12 = vmov 1934713408   ;;  %vm312_vm2 = vcmask 130048  }
  0x11   :  { %373 = vmatpush.msra.mxu2 %v71_v1  ;;  %374 = vmatpush.msra.mxu3 %v71_v1  ;;  %v141_v13 = vunpack.c.l.s4 %v502_v12  ;;  %vm342_vm3 = vcmask 523264   ;;  %s504_s6 = smov [#allocation8]   ;;  %s351_s10 = sshll.u32 %s635_s4, 4  ;;  %s352_s10 = int_to_ptr.hbm [resolvable:$true] %s351_s10 }
  0x12   :  { %99 = vmatpush.msra.mxu0 %v71_v1  ;;  %v552_v10 = vunpack.c.0.s8 %v119_v9  ;;  %s349_s7 = sshll.u32 %s504_s6, 4  ;;  %s350_s7 = int_to_ptr.vmem [resolvable:$true] %s349_s7 }
  0x13   :  { %375 = vmatpush.msra.mxu2 %v70_v2  ;;  %376 = vmatpush.msra.mxu3 %v70_v2  ;;  %v556_v21 = vunpack.c.0.s8 %v141_v13 }
  0x14   :  { %100 = vmatpush.msra.mxu0 %v70_v2 }
  0x15   :  { %377 = vmatpush.msra.mxu2 %v69_v3  ;;  %378 = vmatpush.msra.mxu3 %v69_v3 }
  0x16   :  { %366 = vmatmul.msk.f32.vlgmr.msra.gmra.mxu2 %vm73_vm0, %v66_v4  ;;  %368 = vmatmul.msk.f32.vlgmr.msra.gmra.mxu3 %vm73_vm0, %v68_v5 }
  0x17   :  { %101 = vmatpush.msra.mxu0 %v69_v3 }
  0x18   :  { %365 = vmatmul.msk.f32.vlgmr.msra.gmra.mxu0 %vm73_vm0, %v65_v6 }
  0x1e   :  { %367 = vmatmul.msk.f32.gmra.mxu2 %vm73_vm0, %v67_v7 }
  0x95   :  { %v103_v11 = vpop.f32.mrf.mxu0 }
  0x96   :  { %v115_v16 = vrot.slane %v103_v11, 4  ;;  %v121_v22 = vperm.slane %v103_v11, %v552_v10 }
  0x98   :  { %v117_v29 = vsel %vm116_vm1, 0.0, %v115_v16  ;;  %v138_v37 = vrot.slane %v121_v22, 4 }
  0x99   :  { %v106_v14 = vpop.f32.mrf.mxu2  ;;  %v112_v15 = vpop.f32.mrf.mxu3  ;;  %v125_v36 = vperm.slane %v117_v29, %v552_v10 }
  0x9a   :  { %v168_v17 = vrot.slane %v106_v14, 4  ;;  %v173_v18 = vperm.slane %v106_v14, %v552_v10  ;;  %v178_v19 = vrot.slane %v112_v15, 4  ;;  %v183_v20 = vperm.slane %v112_v15, %v552_v10 }
  0x9b   :  { %v150_v51 = vrot.slane %v125_v36, 4 }
  0x9c   :  { %v169_v23 = vsel %vm116_vm1, 0.0, %v168_v17  ;;  %v190_v24 = vrot.slane %v173_v18, 4  ;;  %v179_v25 = vsel %vm116_vm1, 0.0, %v178_v19  ;;  %v188_v26 = vrot.slane %v183_v20, 4 }
  0x9d   :  { %v177_v27 = vperm.slane %v169_v23, %v552_v10  ;;  %v187_v28 = vperm.slane %v179_v25, %v552_v10 }
  0x9e   :  { %v189_v30 = vsel %vm116_vm1, %v188_v26, %v173_v18  ;;  %v191_v31 = vsel %vm116_vm1, %v183_v20, %v190_v24 }
  0x9f   :  { %v202_v32 = vrot.slane %v177_v27, 4  ;;  %v195_v33 = vperm.slane %v189_v30, %v556_v21  ;;  %v199_v34 = vperm.slane %v191_v31, %v556_v21  ;;  %v200_v35 = vrot.slane %v187_v28, 4 }
  0xa1   :  { %v201_v38 = vsel %vm116_vm1, %v200_v35, %v177_v27  ;;  %v203_v39 = vsel %vm116_vm1, %v187_v28, %v202_v32  ;;  %v212_v40 = vrot.slane %v195_v33, 4  ;;  %v214_v41 = vrot.slane %v199_v34, 4  ;;  %v109_v42 = vpop.f32.mrf.mxu2 }
  0xa2   :  { %v207_v43 = vperm.slane %v201_v38, %v556_v21  ;;  %v211_v44 = vperm.slane %v203_v39, %v556_v21  ;;  %v126_v45 = vrot.slane %v109_v42, 4  ;;  %v131_v46 = vperm.slane %v109_v42, %v552_v10 }
  0xa3   :  { %v215_v47 = vsel %vm116_vm1, 0.0, %v214_v41  ;;  %v213_v52 = vsel %vm116_vm1, 0.0, %v212_v40  ;;  %v258_v57 = vsel %vm116_vm1, %v214_v41, %v195_v33 }
  0xa4   :  { %v216_v48 = vrot.slane %v207_v43, 4  ;;  %v218_v49 = vrot.slane %v211_v44, 4  ;;  %v263_v50 = vrot.slane %v215_v47, 4  ;;  %v127_v53 = vsel %vm116_vm1, 0.0, %v126_v45 }
  0xa5   :  { %v136_v54 = vrot.slane %v131_v46, 4  ;;  %v139_v55 = vsel %vm116_vm1, %v131_v46, %v138_v37  ;;  %v135_v59 = vperm.slane %v127_v53, %v552_v10  ;;  %v262_v13 = vperm.slane %v258_v57, %v552_v10  ;;  %v307_v57 = vld [vmem:[#allocation2 + $0x8] sm:$0xff] }
  0xa6   :  { %v219_v56 = vsel %vm116_vm1, 0.0, %v218_v49  ;;  %v264_v58 = vsel %vm116_vm1, %v263_v50, %v213_v52  ;;  %v147_v63 = vperm.slane %v139_v55, %v556_v21  ;;  %v217_v0 = vsel %vm116_vm1, 0.0, %v216_v48 }
  0xa7   :  { %v268_v60 = vperm.slane %v264_v58, %v552_v10  ;;  %v274_v61 = vrot.slane %v219_v56, 4  ;;  %v137_v62 = vsel %vm116_vm1, %v136_v54, %v121_v22  ;;  %v148_v2 = vrot.slane %v135_v59, 4  ;;  %v306_v56 = vld [vmem:[#allocation2] sm:$0xff] }
  0xa8   :  { %v143_v1 = vperm.slane %v137_v62, %v556_v21  ;;  %v151_v3 = vsel %vm116_vm1, %v135_v59, %v150_v51  ;;  %v162_v5 = vrot.slane %v147_v63, 4  ;;  %v269_v6 = vsel %vm116_vm1, %v218_v49, %v207_v43  ;;  %v393_v58 = vld [vmem:[%s633_s2] ss:$0 sm:$0xff] }
  0xa9   :  { %v159_v4 = vperm.slane %v151_v3, %v556_v21  ;;  %v275_v7 = vsel %vm116_vm1, %v274_v61, %v217_v0  ;;  %v149_v8 = vsel %vm116_vm1, %v148_v2, %v125_v36  ;;  %v280_v12 = vrot.slane %v268_v60, 4 }
  0xaa   :  { %v160_v9 = vrot.slane %v143_v1, 4  ;;  %v279_v11 = vperm.slane %v275_v7, %v552_v10  ;;  %v155_v14 = vperm.slane %v149_v8, %v556_v21  ;;  %v163_v15 = vsel %vm116_vm1, 0.0, %v162_v5 }
  0xab   :  { %v166_v16 = vrot.slane %v159_v4, 4  ;;  %v225_v18 = vrot.slane %v163_v15, 4  ;;  %v273_v22 = vperm.slane %v269_v6, %v552_v10  ;;  %v281_v23 = vsel %vm116_vm1, %v280_v12, %v262_v13 }
  0xac   :  { %v161_v17 = vsel %vm116_vm1, 0.0, %v160_v9  ;;  %v164_v19 = vrot.slane %v155_v14, 4  ;;  %v220_v24 = vsel %vm116_vm1, %v162_v5, %v143_v1  ;;  %v286_v27 = vrot.slane %v279_v11, 4 }
  0xad   :  { %v167_v20 = vsel %vm116_vm1, 0.0, %v166_v16  ;;  %v226_v25 = vsel %vm116_vm1, %v225_v18, %v161_v17  ;;  %v231_v30 = vsel %vm116_vm1, %v166_v16, %v155_v14  ;;  %v285_v32 = vperm.slane %v281_v23, %v556_v21 }
  0xae   :  { %v236_v26 = vrot.slane %v167_v20, 4  ;;  %v165_v28 = vsel %vm116_vm1, 0.0, %v164_v19  ;;  %v230_v29 = vperm.slane %v226_v25, %v552_v10  ;;  %v287_v33 = vsel %vm116_vm1, %v286_v27, %v273_v22 }
  0xaf   :  { %v224_v34 = vperm.slane %v220_v24, %v552_v10  ;;  %v291_v37 = vperm.slane %v287_v33, %v556_v21  ;;  %v235_v38 = vperm.slane %v231_v30, %v552_v10  ;;  %v294_v43 = vrot.slane %v285_v32, 4 }
  0xb0   :  { %v237_v31 = vsel %vm116_vm1, %v236_v26, %v165_v28  ;;  %v242_v36 = vrot.slane %v230_v29, 4 }
  0xb1   :  { %v241_v35 = vperm.slane %v237_v31, %v552_v10  ;;  %v292_v41 = vrot.slane %v291_v37, 4  ;;  %v295_v49 = vsel %vm116_vm1, %v291_v37, %v294_v43 }
  0xb2   :  { %v243_v39 = vsel %vm116_vm1, %v242_v36, %v224_v34 }
  0xb3   :  { %v248_v40 = vrot.slane %v241_v35, 4  ;;  %v247_v42 = vperm.slane %v243_v39, %v556_v21  ;;  %v293_v45 = vsel %vm116_vm1, %v292_v41, %v285_v32 }
  0xb5   :  { %v249_v44 = vsel %vm116_vm1, %v248_v40, %v235_v38  ;;  %v256_v47 = vrot.slane %v247_v42, 4 }
  0xb6   :  { %v253_v46 = vperm.slane %v249_v44, %v556_v21 }
  0xb8   :  { %v257_v48 = vsel %vm116_vm1, %v253_v46, %v256_v47  ;;  %v254_v50 = vrot.slane %v253_v46, 4 }
  0xb9   :  { %v388_v10 = vpack.i.bf16 %v257_v48, %v295_v49 }
  0xba   :  { %v255_v51 = vsel %vm116_vm1, %v254_v50, %v247_v42 }
  0xbb   :  { %389 = vrot.lane.b32.xlu0 %v388_v10, %s503_s3 }
 0x12d   :  { %v390_v52 = vpop.permute.xlu0 %389 }
 0x12e   :  { %v392_v53 = vunpack.i.h.bf16 %v390_v52  ;;  %v391_v54 = vunpack.i.l.bf16 %v390_v52 }
 0x130   :  { %v305_v55 = vsel %vm73_vm0, %v293_v45, %v391_v54  ;;  %v304_v21 = vsel %vm73_vm0, %v255_v51, %v392_v53 }
 0x131   :  { %333 = vmatpush.msra.mxu1 %v305_v55 }
 0x133   :  { %334 = vmatpush.msra.mxu1 %v304_v21 }
 0x134   :  { %369 = vmatmul.msk.f32.vlgmr.msra.gmra.mxu1 %vm312_vm2, %v306_v56 }
 0x13c   :  { %370 = vmatmul.msk.f32.gmra.mxu1 %vm312_vm2, %v307_v57 }
 0x1b1   :  { %v336_v59 = vpop.f32.mrf.mxu1 }
 0x1b2   :  { %v337_v60 = vadd.f32 %v393_v58, %v336_v59 }
 0x1b4   :  { %343 = vst.msk [vmem:[#allocation8] sm:$0xff] %vm342_vm3, %v337_v60 }
 0x1b9   :  { %v339_v61 = vpop.f32.mrf.mxu1 }
 0x1ba   :  { %v340_v62 = vadd.f32 %v393_v58, %v339_v61 }
 0x1bc   :  { %344 = vst.msk [vmem:[#allocation8 + $0x8] sm:$0xff] %vm342_vm3, %v340_v62 }
 0x1bd   :  { %357 = dma.vmem_to_hbm [thread:$0]  %s350_s7, 256, %s352_s10, [#allocation4], %s497_s23, %s497_s23, %s498_s24  }
 0x1be   :  { %494 = dma.done.wait [#allocation4], 256  }
 0x1bf   :  { %495 = vsyncadd [#allocation4], 4294967040 }
 0x1c0   :  { %362 = vsyncpa [#allocation3], 1 }
 0x1c1   :  { %363 = vsyncpa [#allocation6], 1 }
 0x1c2   :  { %364 = vsyncpa [#allocation4], 1 }

</bundles_post_ra>
